<compile_context>
chip_gen: v7x
topology: tpu7x:2x2x1
jax: 0.10.0
libtpu: 0.0.40
codegen_flags: <defaults>
</compile_context>

<pallas_src>
import math

import numpy as np
import jax
import jax.numpy as jnp
from jax.experimental import pallas as pl
from jax.experimental.pallas import tpu as pltpu


def _round_up(x, m):
    return ((x + m - 1) // m) * m


def _cdiv(a, b):
    return -(-a // b)


def _softplus(x):
    # Stable softplus with one exp + one log1p per element (EUP-friendly).
    return jnp.maximum(x, 0.0) + jnp.log1p(jnp.exp(-jnp.abs(x)))


def marginal_mlp_kernel(xt_ref, w1_ref, b1_ref, w2_ref, b2_ref,
                        wh_ref, bh_ref, selh_ref, seld_ref, out_ref):
    # All tensors are "batch on lanes": shape (features, TILE_N).
    w_dtype = w1_ref.dtype                       # f32 or bf16 (matmul inputs)
    xt = xt_ref[...]                             # (inp_dim, T)

    a1 = jnp.tanh(
        jnp.dot(w1_ref[...], xt, preferred_element_type=jnp.float32)
        + b1_ref[...])                           # (hidden, T) f32
    a2 = jnp.tanh(
        jnp.dot(w2_ref[...], a1.astype(w_dtype),
                preferred_element_type=jnp.float32)
        + b2_ref[...])                           # (hidden, T) f32
    # Fused head: [mu ; sigma] in one MXU push.
    head = (jnp.dot(wh_ref[...], a2.astype(w_dtype),
                    preferred_element_type=jnp.float32)
            + bh_ref[...])                       # (head_w, T) f32

    out_dim = seld_ref.shape[1]                  # static
    # Diagonal of scale_tril: softplus(sigma[:out_dim]) + 1e-6.
    diag = _softplus(head[out_dim:2 * out_dim, :]) + 1e-6   # (out_dim, T)

    # Single lane-dense store: slab = [mu ; Sigma_flat], assembled with two
    # static 0/1 selection matmuls (gather + mask + scatter in one MXU op).
    out_ref[...] = (
        jnp.dot(selh_ref[...], head, preferred_element_type=jnp.float32)
        + jnp.dot(seld_ref[...], diag, preferred_element_type=jnp.float32))


def _build_selection_matrices(out_dim, head_w):
    """Static matrices mapping [head; diag] -> [mu ; Sigma_flat] rows.

    Replicates the PyTorch loop exactly: row ip of Sigma takes
    sigma[:, iv:iv+(ip-1)] into columns :ip-1, so element (ip, ip-1) stays 0.
    """
    slab_rows = out_dim + out_dim * out_dim
    sel_head = np.zeros((slab_rows, head_w), np.float32)
    sel_diag = np.zeros((slab_rows, out_dim), np.float32)
    for i in range(out_dim):
        sel_head[i, i] = 1.0                                   # mu rows
        sel_diag[out_dim + i * out_dim + i, i] = 1.0           # Sigma diagonal
    iv = out_dim
    for ip in range(1, out_dim):
        l = ip - 1
        for j in range(l):
            # sigma column (iv + j) lives at fused-head row (out_dim + iv + j).
            sel_head[out_dim + ip * out_dim + j, out_dim + iv + j] = 1.0
        iv += l
    return jnp.asarray(sel_head), jnp.asarray(sel_diag)


def init_params(key, inp_dim, out_dim, hidden_dim):
    """Deterministic PyTorch-Linear-style init (uniform +/- 1/sqrt(fan_in))."""
    sig_dim = out_dim * (out_dim + 1) // 2
    dims = [(inp_dim, hidden_dim), (hidden_dim, hidden_dim),
            (hidden_dim, out_dim), (hidden_dim, sig_dim)]
    params = []
    for (fan_in, fan_out) in dims:
        key, kw, kb = jax.random.split(key, 3)
        bound = 1.0 / math.sqrt(fan_in)
        w = jax.random.uniform(kw, (fan_in, fan_out), jnp.float32, -bound, bound)
        b = jax.random.uniform(kb, (1, fan_out), jnp.float32, -bound, bound)
        params += [w, b]
    return params  # [w1, b1, w2, b2, wmu, bmu, ws, bs]


def marginal_network_forward(x, params, out_dim, use_bf16_matmul=False):
    """Replicates MarginalNetwork.forward; returns (mu, scale_tril)."""
    if x.ndim == 1:
        x = x.reshape(1, -1)
    x = x.astype(jnp.float32)
    n_rows, inp_dim = x.shape
    sig_dim = out_dim * (out_dim + 1) // 2

    w1, b1, w2, b2, wmu, bmu, ws, bs = params
    hidden = w1.shape[1]
    head_w = out_dim + sig_dim
    slab_rows = out_dim + out_dim * out_dim        # [mu ; Sigma_flat]

    # --- one-time layout plumbing (batch-on-lanes) -------------------------
    mm_dtype = jnp.bfloat16 if use_bf16_matmul else jnp.float32
    w1_t = w1.T.astype(mm_dtype)                               # (hidden, inp_dim)
    w2_t = w2.T.astype(mm_dtype)                               # (hidden, hidden)
    wh_t = jnp.concatenate([wmu, ws], axis=1).T.astype(mm_dtype)  # (head_w, hidden)
    b1_t = b1.reshape(hidden, 1).astype(jnp.float32)
    b2_t = b2.reshape(hidden, 1).astype(jnp.float32)
    bh_t = jnp.concatenate([bmu, bs], axis=1).reshape(head_w, 1).astype(jnp.float32)
    sel_head, sel_diag = _build_selection_matrices(out_dim, head_w)

    # --- tiling over the batch (lane) dimension ----------------------------
    # Balanced tiles (cap ~1024 rows), always >= 2 grid steps so v7x can shard
    # across both TensorCores; TILE_N is a multiple of 128 (lane-dense).
    num_tiles = max(2, _cdiv(n_rows, 1024))
    tile_n = _round_up(_cdiv(n_rows, num_tiles), 128)
    num_tiles = max(2, _cdiv(n_rows, tile_n))
    padded_n = num_tiles * tile_n

    x_t = x.T.astype(mm_dtype)                                 # (inp_dim, n_rows)
    if padded_n != n_rows:
        x_t = jnp.pad(x_t, ((0, 0), (0, padded_n - n_rows)))
    grid = (num_tiles,)

    cost = pl.CostEstimate(
        flops=2 * padded_n * (inp_dim * hidden + hidden * hidden
                              + hidden * head_w
                              + slab_rows * head_w + slab_rows * out_dim),
        transcendentals=padded_n * (2 * hidden + 2 * out_dim),
        bytes_accessed=x_t.dtype.itemsize * padded_n * inp_dim
        + 4 * padded_n * slab_rows
        + w1_t.dtype.itemsize * (inp_dim * hidden + hidden * hidden
                                 + hidden * head_w)
        + 4 * (2 * hidden + head_w + slab_rows * (head_w + out_dim)),
    )

    slab = pl.pallas_call(
        marginal_mlp_kernel,
        out_shape=jax.ShapeDtypeStruct((slab_rows, padded_n), jnp.float32),
        grid=grid,
        in_specs=[
            pl.BlockSpec((inp_dim, tile_n), lambda i: (0, i)),   # x^T, tiled on lanes
            pl.BlockSpec((hidden, inp_dim), lambda i: (0, 0)),   # weights resident
            pl.BlockSpec((hidden, 1), lambda i: (0, 0)),
            pl.BlockSpec((hidden, hidden), lambda i: (0, 0)),
            pl.BlockSpec((hidden, 1), lambda i: (0, 0)),
            pl.BlockSpec((head_w, hidden), lambda i: (0, 0)),
            pl.BlockSpec((head_w, 1), lambda i: (0, 0)),
            pl.BlockSpec((slab_rows, head_w), lambda i: (0, 0)),
            pl.BlockSpec((slab_rows, out_dim), lambda i: (0, 0)),
        ],
        out_specs=pl.BlockSpec((slab_rows, tile_n), lambda i: (0, i)),
        compiler_params=pltpu.CompilerParams(
            dimension_semantics=("parallel",)),
        cost_estimate=cost,
    )(x_t, w1_t, b1_t, w2_t, b2_t, wh_t, bh_t, sel_head, sel_diag)

    slab = slab[:, :n_rows]                         # drop lane padding
    mu = slab[:out_dim, :].T                        # (n, out_dim)
    Sigma = slab[out_dim:, :].T.reshape(n_rows, out_dim, out_dim)
    return mu, Sigma


def ref_forward(x, params, out_dim):
    """Pure-JAX reference replicating the PyTorch forward (incl. its quirks)."""
    if x.ndim == 1:
        x = x.reshape(1, -1)
    w1, b1, w2, b2, wmu, bmu, ws, bs = params
    a1 = jnp.tanh(x @ w1 + b1)
    a2 = jnp.tanh(a1 @ w2 + b2)
    mu = a2 @ wmu + bmu
    sigma = a2 @ ws + bs
    n = x.shape[0]
    Sigma = jnp.zeros((n, out_dim, out_dim), jnp.float32)
    idx = jnp.arange(out_dim)
    Sigma = Sigma.at[:, idx, idx].set(jax.nn.softplus(sigma[:, :out_dim]) + 1e-6)
    iv = out_dim
    for ip in range(1, out_dim):
        l = ip - 1
        if l > 0:
            Sigma = Sigma.at[:, ip, :ip - 1].set(sigma[:, iv:iv + l])
        iv += l
    return mu, Sigma


if __name__ == "__main__":
    inp_dim, out_dim, hidden_dim, batch = 8, 4, 32, 2

    key = jax.random.PRNGKey(0)
    key, kx = jax.random.split(key)
    x = jax.random.normal(kx, (batch, inp_dim), jnp.float32)
    params = init_params(key, inp_dim, out_dim, hidden_dim)

    # f32 path (matches the PyTorch reference numerics).
    mu, scale_tril = marginal_network_forward(x, params, out_dim)
    jax.block_until_ready((mu, scale_tril))

    mu_ref, Sigma_ref = ref_forward(x, params, out_dim)
    assert mu.shape == (batch, out_dim)
    assert scale_tril.shape == (batch, out_dim, out_dim)
    assert float(jnp.max(jnp.abs(mu - mu_ref))) < 1e-4
    assert float(jnp.max(jnp.abs(scale_tril - Sigma_ref))) < 1e-4
    # Diagonal must be strictly positive (softplus + 1e-6).
    assert bool(jnp.all(jnp.diagonal(scale_tril, axis1=1, axis2=2) > 0.0))

    # Optional bf16-MXU path (v6e/v7x perf suggestion); looser tolerance.
    mu_bf, Sigma_bf = marginal_network_forward(x, params, out_dim,
                                               use_bf16_matmul=True)
    jax.block_until_ready((mu_bf, Sigma_bf))
    assert float(jnp.max(jnp.abs(mu_bf - mu_ref))) < 0.1
    assert float(jnp.max(jnp.abs(Sigma_bf - Sigma_ref))) < 0.1

    print("KERNEL_OK")
</pallas_src>

<mosaic_0001>
module attributes {stable_mosaic.version = 11 : i64} {
  func.func @marginal_mlp_kernel(%arg0: i32, %arg1: memref<8x128xf32, #tpu.memory_space<vmem>>, %arg2: memref<32x8xf32, #tpu.memory_space<vmem>>, %arg3: memref<32x1xf32, #tpu.memory_space<vmem>>, %arg4: memref<32x32xf32, #tpu.memory_space<vmem>>, %arg5: memref<32x1xf32, #tpu.memory_space<vmem>>, %arg6: memref<14x32xf32, #tpu.memory_space<vmem>>, %arg7: memref<14x1xf32, #tpu.memory_space<vmem>>, %arg8: memref<20x14xf32, #tpu.memory_space<vmem>>, %arg9: memref<20x4xf32, #tpu.memory_space<vmem>>, %arg10: memref<20x128xf32, #tpu.memory_space<vmem>>) attributes {dimension_semantics = [#tpu.dimension_semantics<parallel>], iteration_bounds = array<i64: 2>, scalar_prefetch = 0 : i64, scratch_operands = 0 : i64, tpu.core_type = #tpu.core_type<tc>, window_params = [{transform_indices = @transform_0, window_bounds = array<i64: 8, 128>}, {pipeline_mode = #tpu.pipeline_mode<synchronous>, transform_indices = @transform_1, window_bounds = array<i64: 32, 8>}, {pipeline_mode = #tpu.pipeline_mode<synchronous>, transform_indices = @transform_2, window_bounds = array<i64: 32, 1>}, {pipeline_mode = #tpu.pipeline_mode<synchronous>, transform_indices = @transform_3, window_bounds = array<i64: 32, 32>}, {pipeline_mode = #tpu.pipeline_mode<synchronous>, transform_indices = @transform_4, window_bounds = array<i64: 32, 1>}, {pipeline_mode = #tpu.pipeline_mode<synchronous>, transform_indices = @transform_5, window_bounds = array<i64: 14, 32>}, {pipeline_mode = #tpu.pipeline_mode<synchronous>, transform_indices = @transform_6, window_bounds = array<i64: 14, 1>}, {pipeline_mode = #tpu.pipeline_mode<synchronous>, transform_indices = @transform_7, window_bounds = array<i64: 20, 14>}, {pipeline_mode = #tpu.pipeline_mode<synchronous>, transform_indices = @transform_8, window_bounds = array<i64: 20, 4>}, {transform_indices = @transform_9, window_bounds = array<i64: 20, 128>}]} {
    %c0 = arith.constant 0 : index
    %c0_0 = arith.constant 0 : index
    %0 = vector.load %arg1[%c0, %c0_0] : memref<8x128xf32, #tpu.memory_space<vmem>>, vector<8x128xf32>
    %c0_1 = arith.constant 0 : index
    %c0_2 = arith.constant 0 : index
    %1 = vector.load %arg2[%c0_1, %c0_2] : memref<32x8xf32, #tpu.memory_space<vmem>>, vector<32x8xf32>
    %cst = arith.constant dense<0.000000e+00> : vector<32x128xf32>
    %2 = tpu.matmul %1, %0, %cst {dimension_numbers = #tpu.dot_dimension_numbers<[1], [0], [0], [1], [0, 0, 1, 1], [], []>} : vector<32x8xf32>, vector<8x128xf32>, vector<32x128xf32> -> vector<32x128xf32>
    %c0_3 = arith.constant 0 : index
    %c0_4 = arith.constant 0 : index
    %3 = vector.load %arg3[%c0_3, %c0_4] : memref<32x1xf32, #tpu.memory_space<vmem>>, vector<32x1xf32>
    %4 = vector.broadcast %3 : vector<32x1xf32> to vector<32x128xf32>
    %5 = arith.addf %2, %4 : vector<32x128xf32>
    %6 = math.tanh %5 : vector<32x128xf32>
    %c0_5 = arith.constant 0 : index
    %c0_6 = arith.constant 0 : index
    %7 = vector.load %arg4[%c0_5, %c0_6] : memref<32x32xf32, #tpu.memory_space<vmem>>, vector<32x32xf32>
    %cst_7 = arith.constant dense<0.000000e+00> : vector<32x128xf32>
    %8 = tpu.matmul %7, %6, %cst_7 {dimension_numbers = #tpu.dot_dimension_numbers<[1], [0], [0], [1], [0, 0, 1, 1], [], []>} : vector<32x32xf32>, vector<32x128xf32>, vector<32x128xf32> -> vector<32x128xf32>
    %c0_8 = arith.constant 0 : index
    %c0_9 = arith.constant 0 : index
    %9 = vector.load %arg5[%c0_8, %c0_9] : memref<32x1xf32, #tpu.memory_space<vmem>>, vector<32x1xf32>
    %10 = vector.broadcast %9 : vector<32x1xf32> to vector<32x128xf32>
    %11 = arith.addf %8, %10 : vector<32x128xf32>
    %12 = math.tanh %11 : vector<32x128xf32>
    %c0_10 = arith.constant 0 : index
    %c0_11 = arith.constant 0 : index
    %13 = vector.load %arg6[%c0_10, %c0_11] : memref<14x32xf32, #tpu.memory_space<vmem>>, vector<14x32xf32>
    %cst_12 = arith.constant dense<0.000000e+00> : vector<14x128xf32>
    %14 = tpu.matmul %13, %12, %cst_12 {dimension_numbers = #tpu.dot_dimension_numbers<[1], [0], [0], [1], [0, 0, 1, 1], [], []>} : vector<14x32xf32>, vector<32x128xf32>, vector<14x128xf32> -> vector<14x128xf32>
    %c0_13 = arith.constant 0 : index
    %c0_14 = arith.constant 0 : index
    %15 = vector.load %arg7[%c0_13, %c0_14] : memref<14x1xf32, #tpu.memory_space<vmem>>, vector<14x1xf32>
    %16 = vector.broadcast %15 : vector<14x1xf32> to vector<14x128xf32>
    %17 = arith.addf %14, %16 : vector<14x128xf32>
    %18 = vector.extract_strided_slice %17 {offsets = [4, 0], sizes = [4, 128], strides = [1, 1]} : vector<14x128xf32> to vector<4x128xf32>
    %cst_15 = arith.constant 0.000000e+00 : f32
    %19 = vector.broadcast %cst_15 : f32 to vector<4x128xf32>
    %20 = arith.maximumf %18, %19 : vector<4x128xf32>
    %21 = math.absf %18 : vector<4x128xf32>
    %cst_16 = arith.constant 0.000000e+00 : f32
    %22 = vector.broadcast %cst_16 : f32 to vector<4x128xf32>
    %23 = arith.subf %22, %21 : vector<4x128xf32>
    %24 = math.exp %23 : vector<4x128xf32>
    %25 = math.log1p %24 : vector<4x128xf32>
    %26 = arith.addf %20, %25 : vector<4x128xf32>
    %cst_17 = arith.constant 9.99999997E-7 : f32
    %27 = vector.broadcast %cst_17 : f32 to vector<4x128xf32>
    %28 = arith.addf %26, %27 : vector<4x128xf32>
    %c0_18 = arith.constant 0 : index
    %c0_19 = arith.constant 0 : index
    %29 = vector.load %arg8[%c0_18, %c0_19] : memref<20x14xf32, #tpu.memory_space<vmem>>, vector<20x14xf32>
    %cst_20 = arith.constant dense<0.000000e+00> : vector<20x128xf32>
    %30 = tpu.matmul %29, %17, %cst_20 {dimension_numbers = #tpu.dot_dimension_numbers<[1], [0], [0], [1], [0, 0, 1, 1], [], []>} : vector<20x14xf32>, vector<14x128xf32>, vector<20x128xf32> -> vector<20x128xf32>
    %c0_21 = arith.constant 0 : index
    %c0_22 = arith.constant 0 : index
    %31 = vector.load %arg9[%c0_21, %c0_22] : memref<20x4xf32, #tpu.memory_space<vmem>>, vector<20x4xf32>
    %cst_23 = arith.constant dense<0.000000e+00> : vector<20x128xf32>
    %32 = tpu.matmul %31, %28, %cst_23 {dimension_numbers = #tpu.dot_dimension_numbers<[1], [0], [0], [1], [0, 0, 1, 1], [], []>} : vector<20x4xf32>, vector<4x128xf32>, vector<20x128xf32> -> vector<20x128xf32>
    %33 = arith.addf %30, %32 : vector<20x128xf32>
    %c0_24 = arith.constant 0 : index
    %c0_25 = arith.constant 0 : index
    %34 = vector.load %arg10[%c0_24, %c0_25] : memref<20x128xf32, #tpu.memory_space<vmem>>, vector<20x128xf32>
    tpu.vector_store %arg10[%c0_24, %c0_25], %33 {strides = array<i32>} : memref<20x128xf32, #tpu.memory_space<vmem>>, vector<20x128xf32>,
    return
  }
  func.func @transform_0(%arg0: i32) -> (i32, i32) {
    %c0_i32 = arith.constant 0 : i32
    %c0_i32_0 = arith.constant 0 : i32
    return %c0_i32, %arg0 : i32, i32
  }
  func.func @transform_1(%arg0: i32) -> (i32, i32) {
    %c0_i32 = arith.constant 0 : i32
    %c0_i32_0 = arith.constant 0 : i32
    %c0_i32_1 = arith.constant 0 : i32
    return %c0_i32, %c0_i32_0 : i32, i32
  }
  func.func @transform_2(%arg0: i32) -> (i32, i32) {
    %c0_i32 = arith.constant 0 : i32
    %c0_i32_0 = arith.constant 0 : i32
    %c0_i32_1 = arith.constant 0 : i32
    return %c0_i32, %c0_i32_0 : i32, i32
  }
  func.func @transform_3(%arg0: i32) -> (i32, i32) {
    %c0_i32 = arith.constant 0 : i32
    %c0_i32_0 = arith.constant 0 : i32
    %c0_i32_1 = arith.constant 0 : i32
    return %c0_i32, %c0_i32_0 : i32, i32
  }
  func.func @transform_4(%arg0: i32) -> (i32, i32) {
    %c0_i32 = arith.constant 0 : i32
    %c0_i32_0 = arith.constant 0 : i32
    %c0_i32_1 = arith.constant 0 : i32
    return %c0_i32, %c0_i32_0 : i32, i32
  }
  func.func @transform_5(%arg0: i32) -> (i32, i32) {
    %c0_i32 = arith.constant 0 : i32
    %c0_i32_0 = arith.constant 0 : i32
    %c0_i32_1 = arith.constant 0 : i32
    return %c0_i32, %c0_i32_0 : i32, i32
  }
  func.func @transform_6(%arg0: i32) -> (i32, i32) {
    %c0_i32 = arith.constant 0 : i32
    %c0_i32_0 = arith.constant 0 : i32
    %c0_i32_1 = arith.constant 0 : i32
    return %c0_i32, %c0_i32_0 : i32, i32
  }
  func.func @transform_7(%arg0: i32) -> (i32, i32) {
    %c0_i32 = arith.constant 0 : i32
    %c0_i32_0 = arith.constant 0 : i32
    %c0_i32_1 = arith.constant 0 : i32
    return %c0_i32, %c0_i32_0 : i32, i32
  }
  func.func @transform_8(%arg0: i32) -> (i32, i32) {
    %c0_i32 = arith.constant 0 : i32
    %c0_i32_0 = arith.constant 0 : i32
    %c0_i32_1 = arith.constant 0 : i32
    return %c0_i32, %c0_i32_0 : i32, i32
  }
  func.func @transform_9(%arg0: i32) -> (i32, i32) {
    %c0_i32 = arith.constant 0 : i32
    %c0_i32_0 = arith.constant 0 : i32
    return %c0_i32, %arg0 : i32, i32
  }
}

</mosaic_0001>

<bundles_post_ra>
// kernel: tpu_custom_call.1
= control target key start
LH: loop header
LB: loop body
LE: loop exit
PB: predicated region body
PF: predicated region fallthrough
CT: control target
= control target key end

     0   :  { %14 = vsyncpa [#allocation3], 0  ;;  %s1497_s0 = inlined_call_operand.vmem [shape: f32[8,256], index: 0, kind: input, shape index: {}]   ;;  %s1498_s1 = inlined_call_operand.vmem [shape: f32[32,8], index: 1, kind: input, shape index: {}]   ;;  %s1499_s2 = inlined_call_operand.vmem [shape: f32[32,1], index: 2, kind: input, shape index: {}]   ;;  %s1500_s3 = inlined_call_operand.vmem [shape: f32[32,32], index: 3, kind: input, shape index: {}]   ;;  %s1501_s4 = inlined_call_operand.vmem [shape: f32[32,1], index: 4, kind: input, shape index: {}]   ;;  %s1502_s5 = inlined_call_operand.vmem [shape: f32[14,32], index: 5, kind: input, shape index: {}]   ;;  %s1503_s6 = inlined_call_operand.vmem [shape: f32[14,1], index: 6, kind: input, shape index: {}]   ;;  %s1504_s7 = inlined_call_operand.vmem [shape: f32[20,14], index: 7, kind: input, shape index: {}]   ;;  %s1505_s8 = inlined_call_operand.vmem [shape: f32[20,4], index: 8, kind: input, shape index: {}]   ;;  %s1506_s9 = inlined_call_operand.hbm [shape: f32[20,256], index: 9, kind: output, shape index: {}]  }
   0x1   :  { %16 = vsyncpa [#allocation3 + $0x1], 0  ;;  %s1300_s30 = smov 0   ;;  %s1302_s10 = smov 0  }
   0x2   :  { %s1304_s11 = smov 0   ;;  %s1306_s12 = smov 0  }
   0x3 LB: > { %s1321_s13 = sadd.s32 4294967295, %s1239_s12   ;;  %s973_s14 = sadd.s32 4294967294, %s1239_s12   ;;  %s1239_s12 = sphi %s1306_s12, %s1514_s12   ;;  %s1235_s11 = sphi %s1304_s11, %s1513_s11   ;;  %s1231_s10 = sphi %s1302_s10, %s1512_s10   ;;  %s1227_s30 = sphi %s1300_s30, %s1511_s30  }
   0x4   : > { %s1325_s15 = sadd.s32 1, %s1239_s12   ;;  %s223_s16 = sadd.s32 1, %s1235_s11 }
   0x5   : > { %s220_s17 = ssub.s32 %s1239_s12, %s1325_s15  ;;  %p233_p0 = scmp.ne.s32.totalorder %s1235_s11, %s1231_s10 }
   0x6   : > { %p221_p1 = scmp.eq.s32.totalorder %s220_s17, 0  ;;  %p234_p2 = scmp.eq.s32.totalorder %s1321_s13, 1 }
   0x7   : > { %p239_p3 = scmp.ne.s32.totalorder %s1231_s10, %s1227_s30  ;;  %p240_p4 = scmp.eq.s32.totalorder %s973_s14, 1 }
   0x8   : > { %s1336_s18 = scalar_select %p221_p1, %s1235_s11, %s223_s16  }
   0x9   : > { %p1338_p5 = por %p234_p2, %p233_p0  ;;  %p1342_p6 = por %p240_p4, %p239_p3 }
   0xa   : > { %1507 = sst [smem:[#allocation5_spill]] %s1336_s18  ;;  %p976_p7 = scmp.ge.s32.totalorder %s1239_s12, 1 }
   0xb   : > { %p289_p8 = scmp.lt.s32.totalorder %s1239_s12, 3 }
   0xd   : > { %p290_p9 = pnand %p976_p7, %p289_p8 }
   0xe   : > { %p324_p10 = scmp.lt.s32.totalorder (!%p290_p9), %s1321_s13, 1  ;;  %v329_v0 = vld [vmem:[%s1498_s1] sm:$0xff] (!%p290_p9)  ;;  %vm357_vm0 = vcmask (!%p290_p9), 64512   ;;  %v1241_v1 = vmov (!%p290_p9), 0   ;;  %v335_v3 = vld [vmem:[%s1499_s2 + $0x10] sm:$0xff] (!%p290_p9)  ;;  %v334_v4 = vld [vmem:[%s1499_s2 + $0x8] sm:$0xff] (!%p290_p9) }
   0xf   : > { %293 = sbr.rel (%p290_p9) target bundleno = 994 (0x3e2), region = 56  ;;  %1029 = vmatprep.mubr.msk.f32.mxu0 (!%p290_p9), %vm357_vm0, %v329_v0  ;;  %1155 = vset.pattern.permute.xlu0 (!%p290_p9), %v1241_v1  ;;  %v333_v2 = vld [vmem:[%s1499_s2] sm:$0xff] (!%p290_p9)  ;;  %v336_v5 = vld [vmem:[%s1499_s2 + $0x18] sm:$0xff] (!%p290_p9)  ;;  %v330_v7 = vld [vmem:[%s1498_s1 + $0x8] sm:$0xff] (!%p290_p9)  ;;  %vm487_vm1 = vcmask (!%p290_p9), 261120   ;;  %v1242_v58 = vmov (!%p290_p9), 0.0|0.0  }
  0x10   : > { %339 = vperm.xlu0 (!%p290_p9), %1155, %v333_v2   ;;  %1156 = vset.pattern.permute.xlu1 (!%p290_p9), %v1241_v1  ;;  %v331_v8 = vld [vmem:[%s1498_s1 + $0x10] sm:$0xff] (!%p290_p9)  ;;  %v463_v9 = vld [vmem:[%s1501_s4] sm:$0xff] (!%p290_p9)  ;;  %v464_v10 = vld [vmem:[%s1501_s4 + $0x8] sm:$0xff] (!%p290_p9)  ;;  %v1243_v59 = vmov (!%p290_p9), 0.0   ;;  %vm1244_vm2 = vmmov (!%p290_p9), 0   ;;  %vm811_vm3 = vcmask (!%p290_p9), 1045504  }
  0x11   : > { %349 = vperm.xlu1 (!%p290_p9), %1156, %v335_v3   ;;  %v332_v11 = vld [vmem:[%s1498_s1 + $0x18] sm:$0xff] (!%p290_p9)  ;;  %v465_v12 = vld [vmem:[%s1501_s4 + $0x10] sm:$0xff] (!%p290_p9)  ;;  %v591_v14 = vld [vmem:[%s1503_s6] sm:$0xff] (!%p290_p9)  ;;  %vm1245_vm4 = vmmov (!%p290_p9), 1   ;;  %vm801_vm6 = vcmask (!%p290_p9), 113664   ;;  %vm718_vm8 = vcmask (!%p290_p9), 1043456  }
  0x12   : > { %v466_v13 = vld [vmem:[%s1501_s4 + $0x18] sm:$0xff] (!%p290_p9)  ;;  %v592_v15 = vld [vmem:[%s1503_s6 + $0x8] sm:$0x3f] (!%p290_p9)  ;;  %v459_v16 = vld [vmem:[%s1500_s3] sm:$0xff] (!%p290_p9)  ;;  %vm708_vm9 = vcmask (!%p290_p9), 31744   ;;  %s321_s26 = sand.u32 (!%p290_p9), 1, %s1231_s10  }
  0x13   : > { %1043 = vmatprep.mubr.msk.f32.mxu1 (!%p290_p9), %vm487_vm1, %v459_v16  ;;  %v460_v35 = vld [vmem:[%s1500_s3 + $0x8] sm:$0xff] (!%p290_p9)  ;;  %v461_v36 = vld [vmem:[%s1500_s3 + $0x10] sm:$0xff] (!%p290_p9)  ;;  %v462_v37 = vld [vmem:[%s1500_s3 + $0x18] sm:$0xff] (!%p290_p9)  ;;  %s996_s16 = sshll.u32 (!%p290_p9), %s1321_s13, 7  ;;  %s1456_s21 = scalar_lea.sflag (!%p290_p9), [#allocation3], %s321_s26 }
  0x14   : > { %344 = vperm.xlu0 (!%p290_p9), %1155, %v334_v4   ;;  %v589_v38 = vld [vmem:[%s1502_s5] sm:$0xff] (!%p290_p9)  ;;  %v590_v57 = vld [vmem:[%s1502_s5 + $0x8] sm:$0x3f] (!%p290_p9)  ;;  %vm1102_vm5 = vmpackc.low (!%p290_p9), %vm811_vm3, %vm1245_vm4  ;;  %s1454_s18 = scalar_lea.hbm (!%p290_p9), %s1506_s9, %s996_s16 }
  0x15   : > { %354 = vperm.xlu1 (!%p290_p9), %1156, %v336_v5   ;;  %v700_v5 = vld [vmem:[%s1504_s7] sm:$0xff] (!%p290_p9) }
  0x16   : > { %s325_s27 = scalar_select %p324_p10, %s1321_s13, 1 }
  0x17   : > { %s1246_s13 = smov [#allocation2]  }
  0x18   : > { %s977_s14 = sshll.u32 %s325_s27, 3  ;;  %469 = vperm.xlu0 %1155, %v463_v9   ;;  %s1107_s27 = smul.u32 24, %s321_s26 }
  0x19   : > { %s327_s23 = scalar_lea.vmem %s1497_s0, %s977_s14  ;;  %474 = vperm.xlu1 %1156, %v464_v10  }
  0x1a   : > { %v328_v6 = vld [vmem:[%s327_s23] sm:$0xff]  ;;  %s323_s28 = scalar_lea.vmem [#allocation2], %s1107_s27  ;;  %s1181_s23 = sshll.u32 %s1246_s13, 4  ;;  %s1182_s23 = int_to_ptr.vmem [resolvable:$false] %s1181_s23 }
  0x1b   : > { %1027 = vmatprep.subr.mxu0 %v328_v6  ;;  %s911_s29 = sshll.u32 %s323_s28, 4  ;;  %s1183_s24 = scalar_lea.vmem %s1182_s23, 768  ;;  %s1449_s29 = int_to_ptr.vmem [resolvable:$true] %s911_s29 }
  0x1c   : > { %1028 = vmatpush3.msra.mxu0 %v328_v6  ;;  %479 = vperm.xlu0 %1155, %v465_v12   ;;  %s1177_s22 = scalar_lea.vmem %s1449_s29, 384  ;;  %p1184_p0 = scmp.lt.s32.totalorder %s1449_s29, %s1182_s23 }
  0x1d   : > { %1030 = vmatmul.mubr.msk.f32.vlgmr.msra.gmra.mrb[0].mxu0 %vm357_vm0, %v330_v7  ;;  %484 = vperm.xlu1 %1156, %v466_v13   ;;  %v701_v7 = vld [vmem:[%s1504_s7 + $0x8] sm:$0xff]  ;;  %p1178_p11 = scmp.ne.s32.totalorder %s1449_s29, %s1177_s22  ;;  %p1185_p1 = scmp.lt.s32.totalorder %s1183_s24, %s1177_s22 }
  0x1e   : > { %1032 = vmatprep.mubr.msk.f32.mxu0 %vm357_vm0, %v331_v8  ;;  %v702_v8 = vld [vmem:[%s1504_s7 + $0x10] sm:$0xf] }
  0x1f   : > { %p1179_p12 = pnand %p1178_p11, %p1338_p5  ;;  %p1186_p2 = por %p1185_p1, %p1184_p0 }
  0x20   : > { %595 = vperm.xlu0 %1155, %v591_v14  }
  0x21   : > { %1033 = vmatmul.mubr.msk.f32.gmra.mrb[2].mxu0 %vm357_vm0, %v332_v11  ;;  %600 = vperm.xlu1 %1156, %v592_v15   ;;  %p1180_p13 = pneg %p1179_p12 }
  0x22   : > { %1057 = vmatprep.mubr.msk.f32.mxu0 %vm487_vm1, %v589_v38 }
  0x23   : > { %p1187_p3 = pnand %p1186_p2, %p1180_p13 }
  0x8f   : > { %v340_v17 = vpop.permute.xlu0 %339 }
  0x90   : > { %v350_v18 = vpop.permute.xlu1 %349 }
  0x93   : > { %v345_v19 = vpop.permute.xlu0 %344 }
  0x94   : > { %v355_v24 = vpop.permute.xlu1 %354 }
  0x97   : > { %v470_v40 = vpop.permute.xlu0 %469 }
  0x98   : > { %v475_v39 = vpop.permute.xlu1 %474 }
  0x9b   : > { %v480_v47 = vpop.permute.xlu0 %479 }
  0x9c   : > { %v485_v45 = vpop.permute.xlu1 %484 }
  0x9f   : > { %v596_v62 = vpop.permute.xlu0 %595 }
  0xa0   : > { %v601_v60 = vpop.permute.xlu1 %600 }
  0xf0   : > { %v1031_v20 = vpop.f32.mrb[0].mxu0 }
  0xf1   : > { %v442_v21 = vadd.f32 %v1031_v20, %v345_v19  ;;  %v436_v22 = vpop.f32.mrb[1].mxu0 }
  0xf2   : > { %v437_v23 = vadd.f32 %v436_v22, %v340_v17  ;;  %v703_v22 = vld [vmem:[%s1505_s8] sm:$0xff] }
  0xf3   : > { %1157 = vtanh.f32 %v442_v21 }
  0xf4   : > { %1159 = vtanh.f32 %v437_v23  ;;  %v1034_v25 = vpop.f32.mrb[2].mxu0  ;;  %v704_v23 = vld [vmem:[%s1505_s8 + $0x8] sm:$0xff] }
  0xf5   : > { %v452_v26 = vadd.f32 %v1034_v25, %v355_v24  ;;  %v446_v27 = vpop.f32.mrb[3].mxu0  ;;  %v705_v24 = vld [vmem:[%s1505_s8 + $0x10] sm:$0xf] }
  0xf6   : > { %v447_v28 = vadd.f32 %v446_v27, %v350_v18 }
  0xf7   : > { %1161 = vtanh.f32 %v452_v26 }
  0xf8   : > { %1163 = vtanh.f32 %v447_v28 }
  0xfd   : > { %v1158_v29 = vpop.eup %1157 }
  0xfe   : > { %v1160_v30 = vpop.eup %1159 }
  0xff   : > { %v1084_v31 = vpack.c.bf16 %v1158_v29, %v1160_v30 }
 0x101   : > { %v1162_v32 = vpop.eup %1161  ;;  %1085 = vmatprep.subr.bf16.mxu1 %v1084_v31 }
 0x102   : > { %v1164_v33 = vpop.eup %1163  ;;  %1087 = vmatpush3.bf16.msra.mxu1 %v1084_v31 }
 0x103   : > { %v1088_v34 = vpack.c.bf16 %v1162_v32, %v1164_v33 }
 0x105   : > { %1089 = vmatprep.subr.bf16.mxu1 %v1088_v34 }
 0x106   : > { %1091 = vmatpush3.bf16.msra.mxu1 %v1088_v34 }
 0x107   : > { %1060 = vmatprep.subr.mxu1 %v1243_v59 }
 0x109   : > { %1044 = vmatmul.mubr.msk.f32.vlgmr.msra.gmra.mrb[0].mxu1 %vm487_vm1, %v460_v35 }
 0x10a   : > { %1046 = vmatprep.mubr.msk.f32.mxu1 %vm487_vm1, %v461_v36 }
 0x10d   : > { %1047 = vmatmul.mubr.msk.f32.gmra.mrb[2].mxu1 %vm487_vm1, %v462_v37 }
 0x10e   : > { %1062 = vmatprep.mubr.msk.f32.mxu1 %vm1244_vm2, %v1243_v59 }
 0x1dc   : > { %v1045_v41 = vpop.f32.mrb[0].mxu1 }
 0x1dd   : > { %v572_v42 = vadd.f32 %v1045_v41, %v475_v39  ;;  %v566_v43 = vpop.f32.mrb[1].mxu1 }
 0x1de   : > { %v567_v44 = vadd.f32 %v566_v43, %v470_v40 }
 0x1df   : > { %1165 = vtanh.f32 %v572_v42 }
 0x1e0   : > { %1167 = vtanh.f32 %v567_v44  ;;  %v1048_v46 = vpop.f32.mrb[2].mxu1 }
 0x1e1   : > { %v582_v48 = vadd.f32 %v1048_v46, %v485_v45  ;;  %v576_v49 = vpop.f32.mrb[3].mxu1 }
 0x1e2   : > { %v577_v50 = vadd.f32 %v576_v49, %v480_v47 }
 0x1e3   : > { %1169 = vtanh.f32 %v582_v48 }
 0x1e4   : > { %1171 = vtanh.f32 %v577_v50 }
 0x1e9   : > { %v1166_v51 = vpop.eup %1165 }
 0x1ea   : > { %v1168_v52 = vpop.eup %1167 }
 0x1eb   : > { %v1092_v53 = vpack.c.bf16 %v1166_v51, %v1168_v52 }
 0x1ed   : > { %v1170_v54 = vpop.eup %1169  ;;  %1093 = vmatprep.subr.bf16.mxu0 %v1092_v53 }
 0x1ee   : > { %v1172_v55 = vpop.eup %1171  ;;  %1095 = vmatpush3.bf16.msra.mxu0 %v1092_v53 }
 0x1ef   : > { %v1096_v56 = vpack.c.bf16 %v1170_v54, %v1172_v55 }
 0x1f1   : > { %1097 = vmatprep.subr.bf16.mxu0 %v1096_v56 }
 0x1f2   : > { %1099 = vmatpush3.bf16.msra.mxu0 %v1096_v56 }
 0x1f3   : > { %1100 = vmatprep.subr.bf16.mxu0 %v1242_v58 }
 0x1f5   : > { %1058 = vmatmul.mubr.msk.f32.vlgmr.msra.gmra.mrb[4].mxu0 %vm487_vm1, %v590_v57 }
 0x1f6   : > { %1075 = vmatprep.mubr.msk.f32.mxu0 %vm1244_vm2, %v1243_v59 }
 0x2c8   : > { %v1059_v61 = vpop.f32.mrb[4].mxu0 }
 0x2c9   : > { %v681_v63 = vadd.f32 %v1059_v61, %v601_v60  ;;  %v675_v0 = vpop.f32.mrb[5].mxu0 }
 0x2ca   : > { %v676_v1 = vadd.f32 %v675_v0, %v596_v62 }
 0x2cc   : > { %v685_v2 = vand.u32 2147483647, %v676_v1  ;;  %v1101_v3 = vpack.c.bf16 %v681_v63, %v676_v1  ;;  %v684_v17 = vmax.f32 %v676_v1, 0.0 }
 0x2ce   : > { %v686_v4 = vsub.f32 0.0, %v685_v2  ;;  %1103 = vmatpush3.bf16.msk.msra.mxu0 %vm1102_vm5, %v1101_v3 }
 0x2d0   : > { %v687_v6 = vmul.f32 1.442695, %v686_v4 }
 0x2d1   : > { %1076 = vmatmul.mubr.msk.f32.vlgmr.msra.gmra.mrb[6].mxu0 %vm801_vm6, %v700_v5 }
 0x2d2   : > { %1173 = vpow2.f32 %v687_v6  ;;  %1078 = vmatprep.mubr.msk.f32.mxu0 %vm1244_vm2, %v1243_v59 }
 0x2d5   : > { %1079 = vmatmul.mubr.msk.f32.gmra.mrb[8].mxu0 %vm801_vm6, %v701_v7 }
 0x2d6   : > { %1081 = vmatprep.mubr.msk.f32.mxu0 %vm1244_vm2, %v1243_v59 }
 0x2d9   : > { %1082 = vmatmul.mubr.msk.f32.gmra.mrb[10].mxu0 %vm801_vm6, %v702_v8 }
 0x2dc   : > { %v1174_v9 = vpop.eup %1173 }
 0x2dd   : > { %v689_v10 = vadd.f32 1.0, %v1174_v9  ;;  %v692_v11 = vmul.f32 -0.5, %v1174_v9  ;;  %v695_v13 = vand.u32 2147483647, %v1174_v9 }
 0x2df   : > { %1175 = vlog2.f32 %v689_v10  ;;  %v693_v12 = vadd.f32 1.0, %v692_v11  ;;  %vm696_vm7 = vcmp.lt.f32.partialorder %v695_v13, 0.0004427343 }
 0x2e1   : > { %v694_v16 = vmul.f32 %v1174_v9, %v693_v12 }
 0x2e9   : > { %v1176_v14 = vpop.eup %1175 }
 0x2ea   : > { %v691_v15 = vmul.f32 0.6931472, %v1176_v14 }
 0x2ec   : > { %v697_v18 = vsel %vm696_vm7, %v694_v16, %v691_v15 }
 0x2ed   : > { %v698_v19 = vadd.f32 %v697_v18, %v684_v17 }
 0x2ef   : > { %v699_v20 = vadd.f32 1e-06, %v698_v19 }
 0x2f1   : > { %v707_v21 = vrot.slane %v699_v20, 4 }
 0x2f3   : > { %1061 = vmatpush3.msk.msra.mxu1 %vm718_vm8, %v707_v21 }
 0x2f4   : > { %1063 = vmatmul.mubr.msk.f32.vlgmr.msra.gmra.mrb[4].mxu1 %vm708_vm9, %v703_v22 }
 0x2f5   : > { %1065 = vmatprep.mubr.msk.f32.mxu1 %vm1244_vm2, %v1243_v59 }
 0x2f8   : > { %1066 = vmatmul.mubr.msk.f32.gmra.mrb[6].mxu1 %vm708_vm9, %v704_v23 }
 0x2f9   : > { %1068 = vmatprep.mubr.msk.f32.mxu1 %vm1244_vm2, %v1243_v59 }
 0x2fc   : > { %1069 = vmatmul.mubr.msk.f32.gmra.mrb[8].mxu1 %vm708_vm9, %v705_v24 }
 0x3a4   : > { %v881_v25 = vpop.f32.mrb[6].mxu0 }
 0x3a5   : > { %v1077_v26 = vpop.f32.mrb[7].mxu0 }
 0x3a8   : > { %v886_v27 = vpop.f32.mrb[8].mxu0 }
 0x3a9   : > { %v1080_v28 = vpop.f32.mrb[9].mxu0 }
 0x3ac   : > { %v891_v29 = vpop.f32.mrb[10].mxu0 }
 0x3ad   : > { %v1083_v30 = vpop.f32.mrb[11].mxu0 }
 0x3c7   : > { %v787_v31 = vpop.f32.mrb[4].mxu1 }
 0x3c8   : > { %v882_v32 = vadd.f32 %v881_v25, %v787_v31  ;;  %v1064_v33 = vpop.f32.mrb[5].mxu1 }
 0x3ca   : > { %895 = vst [vmem:[%s323_s28] sm:$0xff] %v882_v32 }
 0x3cb   : > { %v792_v34 = vpop.f32.mrb[6].mxu1 }
 0x3cc   : > { %v887_v35 = vadd.f32 %v886_v27, %v792_v34  ;;  %v1067_v36 = vpop.f32.mrb[7].mxu1 }
 0x3ce   : > { %896 = vst [vmem:[%s323_s28 + $0x8] sm:$0xff] %v887_v35 }
 0x3cf   : > { %v797_v37 = vpop.f32.mrb[8].mxu1 }
 0x3d0   : > { %v892_v38 = vadd.f32 %v891_v29, %v797_v37  ;;  %v1070_v39 = vpop.f32.mrb[9].mxu1 }
 0x3d2   : > { %897 = vst [vmem:[%s323_s28 + $0x10] sm:$0xf] %v892_v38 }
 0x3d3   : > { %1190 = shalt.err (!%p1187_p3)
}
 0x3d4   : > { %s1191_s25 = scalar_lea.hbm %s1454_s18, 384  ;;  %s1195_s28 = scalar_lea.hbm %s1506_s9, 768 }
 0x3d5   : > { %p1192_p4 = scmp.ne.s32.totalorder %s1454_s18, %s1191_s25  ;;  %p1196_p9 = scmp.lt.u32.totalorder %s1454_s18, %s1506_s9 }
 0x3d6   : > { %p1197_p10 = scmp.lt.u32.totalorder %s1195_s28, %s1191_s25  ;;  %p1199_p12 = scmp.lt.u32.totalorder %s1191_s25, %s1454_s18 }
 0x3d7   : > { %p1193_p7 = pnand %p1192_p4, %p1338_p5 }
 0x3d8   : > { %p1198_p11 = por %p1197_p10, %p1196_p9 }
 0x3d9   : > { %p1194_p8 = pneg %p1193_p7 }
 0x3da   : > { %p1200_p13 = por %p1199_p12, %p1198_p11 }
 0x3dc   : > { %p1201_p0 = pnand %p1200_p13, %p1194_p8 }
 0x3de   : > { %1204 = shalt.err (!%p1201_p0)
}
 0x3df   : > { %s1247_s17 = smov 128   ;;  %s1248_s22 = smov 256  }
 0x3e0   : > { %s1249_s13 = smov 8  }
 0x3e1   : > { %1108 = dma.vmem_to_hbm [thread:$0]  (%p1338_p5), %s1449_s29, 384, %s1454_s18, %s1456_s21, %s1247_s17, %s1248_s22, %s1249_s13  }
 0x3e2 PF: > { %p1114_p1 = scmp.ge.s32.totalorder %s1239_s12, 2  ;;  %s926_s23 = sand.u32 1, %s1227_s30  }
 0x3e3   : > { %s927_s24 = scalar_lea.sflag [#allocation3], %s926_s23 }
 0x3e4   : > { %p1111_p2 = pnand %p1114_p1, %p1342_p6 }
 0x3e6   : > { %1222 = dma.done.wait (!%p1111_p2), %s927_s24, 384  }
 0x3e7   : > { %1224 = vsyncadd (!%p1111_p2), %s927_s24, 4294966912  ;;  %s1510_s25 = sld [smem:[#allocation5_spill]]  ;;  %p19_p3 = scmp.ge.s32.totalorder %s1325_s15, 4  }
 0x3e8   : > { %s1511_s30 = smov %s1231_s10  ;;  %s1512_s10 = smov %s1235_s11 }
 0x3e9   : > { %s1514_s12 = smov %s1325_s15  ;;  %21 = sbr.rel (!%p19_p3) target bundleno = 3 (0x3), region = 91 }
 0x3ed   : > { %s1513_s11 = smov %s1510_s25 }
 0x3f0   :  { %932 = vsyncpa [#allocation3], 1 }
 0x3f1   :  { %934 = vsyncpa [#allocation3 + $0x1], 1 }

</bundles_post_ra>
